<compile_context>
chip_gen: v7x
topology: tpu7x:2x2x1
jax: 0.10.0
libtpu: 0.0.40
codegen_flags: <defaults>
</compile_context>

<pallas_src>
import jax
import jax.numpy as jnp
from jax.experimental import pallas as pl
from jax.experimental.pallas import tpu as pltpu


def _round_up(x, m):
    return (x + m - 1) // m * m


def _feature_align_kernel(qg_ref, it_ref, mq_ref, mi_ref, w_ref,
                          negT_item_ref, negT_query_ref, temp_ref,
                          out_ref, acc_loss, acc_cnt):
    r = pl.program_id(1)

    @pl.when(r == 0)
    def _():
        acc_loss[...] = jnp.zeros_like(acc_loss)
        acc_cnt[...] = jnp.zeros_like(acc_cnt)

    inv_temp = 1.0 / temp_ref[0, 0]

    qg = qg_ref[...]            # (GT, D)  unique query rows of this tile
    it = it_ref[...]            # (TR, D)  clicked-item rows, TR = GT*K
    mq = mq_ref[...]            # (GT, K)  mask, grouped layout
    mi = mi_ref[...]            # (TR, 1)  mask, flat layout
    w = w_ref[...]              # (D, D)

    GT, D = qg.shape
    TR = it.shape[0]
    K = TR // GT

    # MXU projections (f32 accumulation).
    qw = jnp.dot(qg, w, preferred_element_type=jnp.float32)   # (GT, D)
    iw = jnp.dot(it, w, preferred_element_type=jnp.float32)   # (TR, D)

    it3 = it.reshape(GT, K, D)
    q_rep = jnp.broadcast_to(qg[:, None, :], (GT, K, D)).reshape(TR, D)

    # ---- query -> item direction (negatives shared per query group) ----
    negl_q = jnp.dot(qw, negT_item_ref[...],
                     preferred_element_type=jnp.float32)      # (GT, M1)
    tnq = jnp.tanh(negl_q) * inv_temp
    nmx_q = jnp.max(tnq, axis=1, keepdims=True)               # (GT, 1)
    s_q = jnp.sum(jnp.exp(tnq - nmx_q), axis=1, keepdims=True)

    pos_q = jnp.sum(qw[:, None, :] * it3, axis=-1)            # (GT, K)
    tq = jnp.tanh(pos_q) * inv_temp
    mx_q = jnp.maximum(tq, nmx_q)
    lse_q = mx_q + jnp.log(jnp.exp(tq - mx_q) + s_q * jnp.exp(nmx_q - mx_q))
    loss_q = lse_q - tq                                       # (GT, K)

    # ---- item -> query direction (per row, flat / lane-dense layout) ----
    negl_i = jnp.dot(iw, negT_query_ref[...],
                     preferred_element_type=jnp.float32)      # (TR, M2)
    tni = jnp.tanh(negl_i) * inv_temp
    nmx_i = jnp.max(tni, axis=1, keepdims=True)               # (TR, 1)
    s_i = jnp.sum(jnp.exp(tni - nmx_i), axis=1, keepdims=True)

    pos_i = jnp.sum(iw * q_rep, axis=1, keepdims=True)        # (TR, 1)
    ti = jnp.tanh(pos_i) * inv_temp
    mx_i = jnp.maximum(ti, nmx_i)
    lse_i = mx_i + jnp.log(jnp.exp(ti - mx_i) + s_i * jnp.exp(nmx_i - mx_i))
    loss_i = lse_i - ti                                       # (TR, 1)

    # Per-step scalar reduction (masked); padded rows carry mask == 0.
    step_loss = jnp.sum(mq * loss_q) + jnp.sum(mi * loss_i)
    step_cnt = jnp.sum(mi)
    acc_loss[...] += jnp.reshape(step_loss, (1, 1))
    acc_cnt[...] += jnp.reshape(step_cnt, (1, 1))

    @pl.when(r == pl.num_programs(1) - 1)
    def _():
        rows = jax.lax.broadcasted_iota(jnp.int32, (8, 128), 0)
        cols = jax.lax.broadcasted_iota(jnp.int32, (8, 128), 1)
        blk = jnp.where((rows == 0) & (cols == 0), acc_loss[...],
                        jnp.where((rows == 0) & (cols == 1), acc_cnt[...], 0.0))
        out_ref[...] = blk[None, :, :]


def feature_align_forward(neg_item_emb, neg_query_emb, query_emb,
                          click_item_mask, q_click_item_emb, W, temp,
                          target_rows_per_tile=1024, core_splits=2):
    f32 = jnp.float32
    B, L, K, D = q_click_item_emb.shape
    G = B * L

    q2 = query_emb.reshape(G, D).astype(f32)              # one row per query group
    it2 = q_click_item_emb.reshape(G * K, D).astype(f32)
    m2 = click_item_mask.reshape(G, K).astype(f32)

    # Group tile: multiple of 8 query groups, ~target_rows_per_tile rows/step.
    group_tile = _round_up(max(target_rows_per_tile // K, 1), 8)
    group_tile = min(group_tile, _round_up(G, 8))
    G_pad = _round_up(G, core_splits * group_tile)

    pad = G_pad - G
    if pad:
        # Padded groups carry mask == 0, so they add nothing to sums or count.
        q2 = jnp.pad(q2, ((0, pad), (0, 0)))
        it2 = jnp.pad(it2, ((0, pad * K), (0, 0)))
        m2 = jnp.pad(m2, ((0, pad), (0, 0)))
    m_flat = m2.reshape(G_pad * K, 1)

    # Hoist the transpose of the negatives out of the kernel.
    negT_item = neg_item_emb.astype(f32).T                 # (D, M1)
    negT_query = neg_query_emb.astype(f32).T               # (D, M2)
    M1 = negT_item.shape[1]
    M2 = negT_query.shape[1]
    temp_arr = jnp.reshape(temp.astype(f32), (1, 1))

    row_tile = group_tile * K
    T = G_pad // (core_splits * group_tile)                # tiles per core
    grid = (core_splits, T)

    out = pl.pallas_call(
        _feature_align_kernel,
        out_shape=jax.ShapeDtypeStruct((core_splits, 8, 128), f32),
        grid_spec=pltpu.PrefetchScalarGridSpec(
            num_scalar_prefetch=0,
            grid=grid,
            in_specs=[
                pl.BlockSpec((group_tile, D), lambda c, r: (c * T + r, 0)),  # queries
                pl.BlockSpec((row_tile, D), lambda c, r: (c * T + r, 0)),    # items
                pl.BlockSpec((group_tile, K), lambda c, r: (c * T + r, 0)),  # mask (G,K)
                pl.BlockSpec((row_tile, 1), lambda c, r: (c * T + r, 0)),    # mask flat
                pl.BlockSpec((D, D), lambda c, r: (0, 0)),                   # W
                pl.BlockSpec((D, M1), lambda c, r: (0, 0)),                  # neg_item^T
                pl.BlockSpec((D, M2), lambda c, r: (0, 0)),                  # neg_query^T
                pl.BlockSpec(memory_space=pltpu.MemorySpace.SMEM),           # temp
            ],
            out_specs=pl.BlockSpec((1, 8, 128), lambda c, r: (c, 0, 0)),
            scratch_shapes=[
                pltpu.VMEM((1, 1), f32),   # running masked loss sum
                pltpu.VMEM((1, 1), f32),   # running mask count
            ],
        ),
        compiler_params=pltpu.CompilerParams(
            dimension_semantics=("parallel", "arbitrary")),
    )(q2, it2, m2, m_flat, W.astype(f32), negT_item, negT_query, temp_arr)

    loss_sum = jnp.sum(out[:, 0, 0])
    cnt = jnp.sum(out[:, 0, 1])
    # Guard against an all-false mask (reference would NaN there as well).
    return 0.5 * loss_sum / jnp.maximum(cnt, 1.0)


def feature_align_reference(neg_item_emb, neg_query_emb, query_emb,
                            click_item_mask, q_click_item_emb, W, temp):
    B, L, K, D = q_click_item_emb.shape
    qe = jnp.broadcast_to(query_emb[:, :, None, :], (B, L, K, D)).reshape(-1, D)
    ie = q_click_item_emb.reshape(-1, D)
    m = click_item_mask.reshape(-1).astype(jnp.float32)

    def ce(a, b, neg):
        aw = a @ W
        pos = jnp.tanh(jnp.sum(aw * b, axis=1)) / temp
        negl = jnp.tanh(aw @ neg.T) / temp
        logits = jnp.concatenate([pos[:, None], negl], axis=1)
        lse = jax.scipy.special.logsumexp(logits, axis=1)
        return lse - pos

    cnt = jnp.sum(m)
    lq = jnp.sum(m * ce(qe, ie, neg_item_emb)) / cnt
    li = jnp.sum(m * ce(ie, qe, neg_query_emb)) / cnt
    return 0.5 * (lq + li)


if __name__ == "__main__":
    key = jax.random.PRNGKey(0)
    B, L, K, D = 2, 4, 4, 32          # batch, query-history, clicks/query, hdim
    M_NEG_ITEM, M_NEG_QUERY = 8, 8
    temp_init = 0.1

    k0, k1, k2, k3, k4, k5 = jax.random.split(key, 6)
    query_emb = jax.random.normal(k0, (B, L, D), dtype=jnp.float32)
    q_click_item_emb = jax.random.normal(k1, (B, L, K, D), dtype=jnp.float32)
    click_item_mask = jax.random.bernoulli(k2, 0.6, (B, L, K))
    # guarantee at least one selected row (torch.masked_select also needs >0)
    click_item_mask = click_item_mask.at[0, 0, 0].set(True)
    neg_item_emb = jax.random.normal(k3, (M_NEG_ITEM, D), dtype=jnp.float32)
    neg_query_emb = jax.random.normal(k4, (M_NEG_QUERY, D), dtype=jnp.float32)

    # deterministic parameter init (matches nn.Parameter shapes):
    #   temp = ones([]) * temp_init ; weight_matrix ~ xavier_normal((D, D))
    xavier_std = (2.0 / (D + D)) ** 0.5
    W = jax.random.normal(k5, (D, D), dtype=jnp.float32) * xavier_std
    temp = jnp.asarray(temp_init, dtype=jnp.float32)

    loss = feature_align_forward(neg_item_emb, neg_query_emb, query_emb,
                                 click_item_mask, q_click_item_emb, W, temp)
    loss = jax.block_until_ready(loss)

    ref = feature_align_reference(neg_item_emb, neg_query_emb, query_emb,
                                  click_item_mask, q_click_item_emb, W, temp)
    assert jnp.allclose(loss, ref, atol=1e-4, rtol=1e-4), (loss, ref)
    print("KERNEL_OK")
</pallas_src>

<mosaic_0001>
module attributes {stable_mosaic.version = 11 : i64} {
  func.func @_feature_align_kernel(%arg0: i32, %arg1: i32, %arg2: memref<8x32xf32, #tpu.memory_space<vmem>>, %arg3: memref<32x32xf32, #tpu.memory_space<vmem>>, %arg4: memref<8x4xf32, #tpu.memory_space<vmem>>, %arg5: memref<32x1xf32, #tpu.memory_space<vmem>>, %arg6: memref<32x32xf32, #tpu.memory_space<vmem>>, %arg7: memref<32x8xf32, #tpu.memory_space<vmem>>, %arg8: memref<32x8xf32, #tpu.memory_space<vmem>>, %arg9: memref<1x1xf32, #tpu.memory_space<smem>>, %arg10: memref<1x8x128xf32, #tpu.memory_space<vmem>>, %arg11: memref<1x1xf32, #tpu.memory_space<vmem>>, %arg12: memref<1x1xf32, #tpu.memory_space<vmem>>) attributes {dimension_semantics = [#tpu.dimension_semantics<parallel>, #tpu.dimension_semantics<arbitrary>], iteration_bounds = array<i64: 2, 1>, scalar_prefetch = 0 : i64, scratch_operands = 2 : i64, tpu.core_type = #tpu.core_type<tc>, window_params = [{transform_indices = @transform_0, window_bounds = array<i64: 8, 32>}, {transform_indices = @transform_1, window_bounds = array<i64: 32, 32>}, {transform_indices = @transform_2, window_bounds = array<i64: 8, 4>}, {transform_indices = @transform_3, window_bounds = array<i64: 32, 1>}, {pipeline_mode = #tpu.pipeline_mode<synchronous>, transform_indices = @transform_4, window_bounds = array<i64: 32, 32>}, {pipeline_mode = #tpu.pipeline_mode<synchronous>, transform_indices = @transform_5, window_bounds = array<i64: 32, 8>}, {pipeline_mode = #tpu.pipeline_mode<synchronous>, transform_indices = @transform_6, window_bounds = array<i64: 32, 8>}, {transform_indices = @transform_7, window_bounds = array<i64: 1, 1>}, {transform_indices = @transform_8, window_bounds = array<i64: 1, 8, 128>}]} {
    %c0_i32 = arith.constant 0 : i32
    %0 = arith.cmpi eq, %arg1, %c0_i32 : i32
    %1 = arith.extui %0 : i1 to i32
    %c0_i32_0 = arith.constant 0 : i32
    %2 = arith.cmpi ne, %1, %c0_i32_0 : i32
    scf.if %2 {
      %cst_39 = arith.constant 0.000000e+00 : f32
      %103 = vector.broadcast %cst_39 : f32 to vector<1x1xf32>
      %c0_40 = arith.constant 0 : index
      %c0_41 = arith.constant 0 : index
      %104 = vector.load %arg11[%c0_40, %c0_41] : memref<1x1xf32, #tpu.memory_space<vmem>>, vector<1x1xf32>
      tpu.vector_store %arg11[%c0_40, %c0_41], %103 {strides = array<i32>} : memref<1x1xf32, #tpu.memory_space<vmem>>, vector<1x1xf32>,
      %cst_42 = arith.constant 0.000000e+00 : f32
      %105 = vector.broadcast %cst_42 : f32 to vector<1x1xf32>
      %c0_43 = arith.constant 0 : index
      %c0_44 = arith.constant 0 : index
      %106 = vector.load %arg12[%c0_43, %c0_44] : memref<1x1xf32, #tpu.memory_space<vmem>>, vector<1x1xf32>
      tpu.vector_store %arg12[%c0_43, %c0_44], %105 {strides = array<i32>} : memref<1x1xf32, #tpu.memory_space<vmem>>, vector<1x1xf32>,
    } else {
    }
    %c0 = arith.constant 0 : index
    %c0_1 = arith.constant 0 : index
    %3 = memref.load %arg9[%c0, %c0_1] : memref<1x1xf32, #tpu.memory_space<smem>>
    %cst = arith.constant 1.000000e+00 : f32
    %4 = arith.divf %cst, %3 : f32
    %c0_2 = arith.constant 0 : index
    %c0_3 = arith.constant 0 : index
    %5 = vector.load %arg2[%c0_2, %c0_3] : memref<8x32xf32, #tpu.memory_space<vmem>>, vector<8x32xf32>
    %c0_4 = arith.constant 0 : index
    %c0_5 = arith.constant 0 : index
    %6 = vector.load %arg3[%c0_4, %c0_5] : memref<32x32xf32, #tpu.memory_space<vmem>>, vector<32x32xf32>
    %c0_6 = arith.constant 0 : index
    %c0_7 = arith.constant 0 : index
    %7 = vector.load %arg4[%c0_6, %c0_7] : memref<8x4xf32, #tpu.memory_space<vmem>>, vector<8x4xf32>
    %c0_8 = arith.constant 0 : index
    %c0_9 = arith.constant 0 : index
    %8 = vector.load %arg5[%c0_8, %c0_9] : memref<32x1xf32, #tpu.memory_space<vmem>>, vector<32x1xf32>
    %c0_10 = arith.constant 0 : index
    %c0_11 = arith.constant 0 : index
    %9 = vector.load %arg6[%c0_10, %c0_11] : memref<32x32xf32, #tpu.memory_space<vmem>>, vector<32x32xf32>
    %cst_12 = arith.constant dense<0.000000e+00> : vector<8x32xf32>
    %10 = tpu.matmul %5, %9, %cst_12 {dimension_numbers = #tpu.dot_dimension_numbers<[1], [0], [0], [1], [0, 0, 1, 1], [], []>} : vector<8x32xf32>, vector<32x32xf32>, vector<8x32xf32> -> vector<8x32xf32>
    %cst_13 = arith.constant dense<0.000000e+00> : vector<32x32xf32>
    %11 = tpu.matmul %6, %9, %cst_13 {dimension_numbers = #tpu.dot_dimension_numbers<[1], [0], [0], [1], [0, 0, 1, 1], [], []>} : vector<32x32xf32>, vector<32x32xf32>, vector<32x32xf32> -> vector<32x32xf32>
    %12 = vector.shape_cast %6 : vector<32x32xf32> to vector<8x4x32xf32>
    %13 = vector.shape_cast %5 : vector<8x32xf32> to vector<8x1x32xf32>
    %14 = vector.shape_cast %13 : vector<8x1x32xf32> to vector<8x1x32xf32>
    %15 = vector.broadcast %14 : vector<8x1x32xf32> to vector<8x4x32xf32>
    %16 = vector.shape_cast %15 : vector<8x4x32xf32> to vector<32x32xf32>
    %c0_14 = arith.constant 0 : index
    %c0_15 = arith.constant 0 : index
    %17 = vector.load %arg7[%c0_14, %c0_15] : memref<32x8xf32, #tpu.memory_space<vmem>>, vector<32x8xf32>
    %cst_16 = arith.constant dense<0.000000e+00> : vector<8x8xf32>
    %18 = tpu.matmul %10, %17, %cst_16 {dimension_numbers = #tpu.dot_dimension_numbers<[1], [0], [0], [1], [0, 0, 1, 1], [], []>} : vector<8x32xf32>, vector<32x8xf32>, vector<8x8xf32> -> vector<8x8xf32>
    %19 = math.tanh %18 : vector<8x8xf32>
    %20 = vector.broadcast %4 : f32 to vector<8x8xf32>
    %21 = arith.mulf %19, %20 : vector<8x8xf32>
    %cst_17 = arith.constant dense<0xFF800000> : vector<8xf32>
    %22 = vector.multi_reduction <maximumf>, %21, %cst_17 [1] : vector<8x8xf32> to vector<8xf32>
    %23 = vector.shape_cast %22 : vector<8xf32> to vector<8x1xf32>
    %24 = vector.broadcast %23 : vector<8x1xf32> to vector<8x8xf32>
    %25 = arith.subf %21, %24 : vector<8x8xf32>
    %26 = math.exp %25 : vector<8x8xf32>
    %cst_18 = arith.constant dense<0.000000e+00> : vector<8xf32>
    %27 = vector.multi_reduction <add>, %26, %cst_18 [1] : vector<8x8xf32> to vector<8xf32>
    %28 = vector.shape_cast %27 : vector<8xf32> to vector<8x1xf32>
    %29 = vector.shape_cast %10 : vector<8x32xf32> to vector<8x1x32xf32>
    %30 = vector.broadcast %29 : vector<8x1x32xf32> to vector<8x4x32xf32>
    %31 = arith.mulf %30, %12 : vector<8x4x32xf32>
    %cst_19 = arith.constant dense<0.000000e+00> : vector<8x4xf32>
    %32 = vector.multi_reduction <add>, %31, %cst_19 [2] : vector<8x4x32xf32> to vector<8x4xf32>
    %33 = math.tanh %32 : vector<8x4xf32>
    %34 = vector.broadcast %4 : f32 to vector<8x4xf32>
    %35 = arith.mulf %33, %34 : vector<8x4xf32>
    %36 = vector.broadcast %23 : vector<8x1xf32> to vector<8x4xf32>
    %37 = arith.maximumf %35, %36 : vector<8x4xf32>
    %38 = arith.subf %35, %37 : vector<8x4xf32>
    %39 = math.exp %38 : vector<8x4xf32>
    %40 = vector.broadcast %23 : vector<8x1xf32> to vector<8x4xf32>
    %41 = arith.subf %40, %37 : vector<8x4xf32>
    %42 = math.exp %41 : vector<8x4xf32>
    %43 = vector.broadcast %28 : vector<8x1xf32> to vector<8x4xf32>
    %44 = arith.mulf %43, %42 : vector<8x4xf32>
    %45 = arith.addf %39, %44 : vector<8x4xf32>
    %46 = math.log %45 : vector<8x4xf32>
    %47 = arith.addf %37, %46 : vector<8x4xf32>
    %48 = arith.subf %47, %35 : vector<8x4xf32>
    %c0_20 = arith.constant 0 : index
    %c0_21 = arith.constant 0 : index
    %49 = vector.load %arg8[%c0_20, %c0_21] : memref<32x8xf32, #tpu.memory_space<vmem>>, vector<32x8xf32>
    %cst_22 = arith.constant dense<0.000000e+00> : vector<32x8xf32>
    %50 = tpu.matmul %11, %49, %cst_22 {dimension_numbers = #tpu.dot_dimension_numbers<[1], [0], [0], [1], [0, 0, 1, 1], [], []>} : vector<32x32xf32>, vector<32x8xf32>, vector<32x8xf32> -> vector<32x8xf32>
    %51 = math.tanh %50 : vector<32x8xf32>
    %52 = vector.broadcast %4 : f32 to vector<32x8xf32>
    %53 = arith.mulf %51, %52 : vector<32x8xf32>
    %cst_23 = arith.constant dense<0xFF800000> : vector<32xf32>
    %54 = vector.multi_reduction <maximumf>, %53, %cst_23 [1] : vector<32x8xf32> to vector<32xf32>
    %55 = vector.shape_cast %54 : vector<32xf32> to vector<32x1xf32>
    %56 = vector.broadcast %55 : vector<32x1xf32> to vector<32x8xf32>
    %57 = arith.subf %53, %56 : vector<32x8xf32>
    %58 = math.exp %57 : vector<32x8xf32>
    %cst_24 = arith.constant dense<0.000000e+00> : vector<32xf32>
    %59 = vector.multi_reduction <add>, %58, %cst_24 [1] : vector<32x8xf32> to vector<32xf32>
    %60 = vector.shape_cast %59 : vector<32xf32> to vector<32x1xf32>
    %61 = arith.mulf %11, %16 : vector<32x32xf32>
    %cst_25 = arith.constant dense<0.000000e+00> : vector<32xf32>
    %62 = vector.multi_reduction <add>, %61, %cst_25 [1] : vector<32x32xf32> to vector<32xf32>
    %63 = vector.shape_cast %62 : vector<32xf32> to vector<32x1xf32>
    %64 = math.tanh %63 : vector<32x1xf32>
    %65 = vector.broadcast %4 : f32 to vector<32x1xf32>
    %66 = arith.mulf %64, %65 : vector<32x1xf32>
    %67 = arith.maximumf %66, %55 : vector<32x1xf32>
    %68 = arith.subf %66, %67 : vector<32x1xf32>
    %69 = math.exp %68 : vector<32x1xf32>
    %70 = arith.subf %55, %67 : vector<32x1xf32>
    %71 = math.exp %70 : vector<32x1xf32>
    %72 = arith.mulf %60, %71 : vector<32x1xf32>
    %73 = arith.addf %69, %72 : vector<32x1xf32>
    %74 = math.log %73 : vector<32x1xf32>
    %75 = arith.addf %67, %74 : vector<32x1xf32>
    %76 = arith.subf %75, %66 : vector<32x1xf32>
    %77 = arith.mulf %7, %48 : vector<8x4xf32>
    %78 = vector.shape_cast %77 : vector<8x4xf32> to vector<1x8x4xf32>
    %cst_26 = arith.constant dense<0.000000e+00> : vector<1xf32>
    %79 = vector.multi_reduction <add>, %78, %cst_26 [1, 2] : vector<1x8x4xf32> to vector<1xf32>
    %80 = vector.shape_cast %79 : vector<1xf32> to vector<1x1x1xf32>
    %81 = vector.extract %80[0, 0, 0] : f32 from vector<1x1x1xf32>
    %82 = arith.mulf %8, %76 : vector<32x1xf32>
    %83 = vector.shape_cast %82 : vector<32x1xf32> to vector<1x32x1xf32>
    %cst_27 = arith.constant dense<0.000000e+00> : vector<1xf32>
    %84 = vector.multi_reduction <add>, %83, %cst_27 [1, 2] : vector<1x32x1xf32> to vector<1xf32>
    %85 = vector.shape_cast %84 : vector<1xf32> to vector<1x1x1xf32>
    %86 = vector.extract %85[0, 0, 0] : f32 from vector<1x1x1xf32>
    %87 = arith.addf %81, %86 : f32
    %88 = vector.shape_cast %8 : vector<32x1xf32> to vector<1x32x1xf32>
    %cst_28 = arith.constant dense<0.000000e+00> : vector<1xf32>
    %89 = vector.multi_reduction <add>, %88, %cst_28 [1, 2] : vector<1x32x1xf32> to vector<1xf32>
    %90 = vector.shape_cast %89 : vector<1xf32> to vector<1x1x1xf32>
    %91 = vector.extract %90[0, 0, 0] : f32 from vector<1x1x1xf32>
    %c0_29 = arith.constant 0 : index
    %c0_30 = arith.constant 0 : index
    %92 = vector.load %arg11[%c0_29, %c0_30] : memref<1x1xf32, #tpu.memory_space<vmem>>, vector<1x1xf32>
    %93 = vector.broadcast %87 : f32 to vector<1x1xf32>
    %94 = arith.addf %92, %93 : vector<1x1xf32>
    %c0_31 = arith.constant 0 : index
    %c0_32 = arith.constant 0 : index
    %95 = vector.load %arg11[%c0_31, %c0_32] : memref<1x1xf32, #tpu.memory_space<vmem>>, vector<1x1xf32>
    tpu.vector_store %arg11[%c0_31, %c0_32], %94 {strides = array<i32>} : memref<1x1xf32, #tpu.memory_space<vmem>>, vector<1x1xf32>,
    %c0_33 = arith.constant 0 : index
    %c0_34 = arith.constant 0 : index
    %96 = vector.load %arg12[%c0_33, %c0_34] : memref<1x1xf32, #tpu.memory_space<vmem>>, vector<1x1xf32>
    %97 = vector.broadcast %91 : f32 to vector<1x1xf32>
    %98 = arith.addf %96, %97 : vector<1x1xf32>
    %c0_35 = arith.constant 0 : index
    %c0_36 = arith.constant 0 : index
    %99 = vector.load %arg12[%c0_35, %c0_36] : memref<1x1xf32, #tpu.memory_space<vmem>>, vector<1x1xf32>
    tpu.vector_store %arg12[%c0_35, %c0_36], %98 {strides = array<i32>} : memref<1x1xf32, #tpu.memory_space<vmem>>, vector<1x1xf32>,
    %c0_i32_37 = arith.constant 0 : i32
    %100 = arith.cmpi eq, %arg1, %c0_i32_37 : i32
    %101 = arith.extui %100 : i1 to i32
    %c0_i32_38 = arith.constant 0 : i32
    %102 = arith.cmpi ne, %101, %c0_i32_38 : i32
    scf.if %102 {
      %103 = tpu.iota {dimensions = array<i32: 0>} : vector<8x128xi32>
      %104 = tpu.iota {dimensions = array<i32: 1>} : vector<8x128xi32>
      %c0_i32_39 = arith.constant 0 : i32
      %105 = vector.broadcast %c0_i32_39 : i32 to vector<8x128xi32>
      %106 = arith.cmpi eq, %103, %105 : vector<8x128xi32>
      %c0_i32_40 = arith.constant 0 : i32
      %107 = vector.broadcast %c0_i32_40 : i32 to vector<8x128xi32>
      %108 = arith.cmpi eq, %104, %107 : vector<8x128xi32>
      %109 = arith.andi %106, %108 : vector<8x128xi1>
      %c0_41 = arith.constant 0 : index
      %c0_42 = arith.constant 0 : index
      %110 = vector.load %arg11[%c0_41, %c0_42] : memref<1x1xf32, #tpu.memory_space<vmem>>, vector<1x1xf32>
      %c0_i32_43 = arith.constant 0 : i32
      %111 = vector.broadcast %c0_i32_43 : i32 to vector<8x128xi32>
      %112 = arith.cmpi eq, %103, %111 : vector<8x128xi32>
      %c1_i32 = arith.constant 1 : i32
      %113 = vector.broadcast %c1_i32 : i32 to vector<8x128xi32>
      %114 = arith.cmpi eq, %104, %113 : vector<8x128xi32>
      %115 = arith.andi %112, %114 : vector<8x128xi1>
      %c0_44 = arith.constant 0 : index
      %c0_45 = arith.constant 0 : index
      %116 = vector.load %arg12[%c0_44, %c0_45] : memref<1x1xf32, #tpu.memory_space<vmem>>, vector<1x1xf32>
      %cst_46 = arith.constant 0.000000e+00 : f32
      %117 = vector.shape_cast %116 : vector<1x1xf32> to vector<1x1xf32>
      %118 = vector.broadcast %117 : vector<1x1xf32> to vector<8x128xf32>
      %119 = vector.broadcast %cst_46 : f32 to vector<8x128xf32>
      %120 = arith.select %115, %118, %119 : vector<8x128xi1>, vector<8x128xf32>
      %121 = vector.shape_cast %110 : vector<1x1xf32> to vector<1x1xf32>
      %122 = vector.broadcast %121 : vector<1x1xf32> to vector<8x128xf32>
      %123 = arith.select %109, %122, %120 : vector<8x128xi1>, vector<8x128xf32>
      %124 = vector.shape_cast %123 : vector<8x128xf32> to vector<1x8x128xf32>
      %c0_47 = arith.constant 0 : index
      %c0_48 = arith.constant 0 : index
      %c0_49 = arith.constant 0 : index
      %125 = vector.load %arg10[%c0_47, %c0_48, %c0_49] : memref<1x8x128xf32, #tpu.memory_space<vmem>>, vector<1x8x128xf32>
      tpu.vector_store %arg10[%c0_47, %c0_48, %c0_49], %124 {strides = array<i32>} : memref<1x8x128xf32, #tpu.memory_space<vmem>>, vector<1x8x128xf32>,
    } else {
    }
    return
  }
  func.func @transform_0(%arg0: i32, %arg1: i32) -> (i32, i32) {
    %c1_i32 = arith.constant 1 : i32
    %0 = arith.muli %arg0, %c1_i32 : i32
    %1 = arith.addi %0, %arg1 : i32
    %c0_i32 = arith.constant 0 : i32
    %c0_i32_0 = arith.constant 0 : i32
    return %1, %c0_i32 : i32, i32
  }
  func.func @transform_1(%arg0: i32, %arg1: i32) -> (i32, i32) {
    %c1_i32 = arith.constant 1 : i32
    %0 = arith.muli %arg0, %c1_i32 : i32
    %1 = arith.addi %0, %arg1 : i32
    %c0_i32 = arith.constant 0 : i32
    %c0_i32_0 = arith.constant 0 : i32
    return %1, %c0_i32 : i32, i32
  }
  func.func @transform_2(%arg0: i32, %arg1: i32) -> (i32, i32) {
    %c1_i32 = arith.constant 1 : i32
    %0 = arith.muli %arg0, %c1_i32 : i32
    %1 = arith.addi %0, %arg1 : i32
    %c0_i32 = arith.constant 0 : i32
    %c0_i32_0 = arith.constant 0 : i32
    return %1, %c0_i32 : i32, i32
  }
  func.func @transform_3(%arg0: i32, %arg1: i32) -> (i32, i32) {
    %c1_i32 = arith.constant 1 : i32
    %0 = arith.muli %arg0, %c1_i32 : i32
    %1 = arith.addi %0, %arg1 : i32
    %c0_i32 = arith.constant 0 : i32
    %c0_i32_0 = arith.constant 0 : i32
    return %1, %c0_i32 : i32, i32
  }
  func.func @transform_4(%arg0: i32, %arg1: i32) -> (i32, i32) {
    %c0_i32 = arith.constant 0 : i32
    %c0_i32_0 = arith.constant 0 : i32
    %c0_i32_1 = arith.constant 0 : i32
    return %c0_i32, %c0_i32_0 : i32, i32
  }
  func.func @transform_5(%arg0: i32, %arg1: i32) -> (i32, i32) {
    %c0_i32 = arith.constant 0 : i32
    %c0_i32_0 = arith.constant 0 : i32
    %c0_i32_1 = arith.constant 0 : i32
    return %c0_i32, %c0_i32_0 : i32, i32
  }
  func.func @transform_6(%arg0: i32, %arg1: i32) -> (i32, i32) {
    %c0_i32 = arith.constant 0 : i32
    %c0_i32_0 = arith.constant 0 : i32
    %c0_i32_1 = arith.constant 0 : i32
    return %c0_i32, %c0_i32_0 : i32, i32
  }
  func.func @transform_7(%arg0: i32, %arg1: i32) -> (i32, i32) {
    %c0_i32 = arith.constant 0 : i32
    %c0_i32_0 = arith.constant 0 : i32
    %c0_i32_1 = arith.constant 0 : i32
    return %c0_i32, %c0_i32_0 : i32, i32
  }
  func.func @transform_8(%arg0: i32, %arg1: i32) -> (i32, i32, i32) {
    %c0_i32 = arith.constant 0 : i32
    %c0_i32_0 = arith.constant 0 : i32
    %c0_i32_1 = arith.constant 0 : i32
    return %arg0, %c0_i32, %c0_i32_0 : i32, i32, i32
  }
}

</mosaic_0001>

<bundles_post_ra>
// kernel: tpu_custom_call.1
= control target key start
LH: loop header
LB: loop body
LE: loop exit
PB: predicated region body
PF: predicated region fallthrough
CT: control target
= control target key end

     0   :  { %s2676_s0 = inlined_call_operand.vmem [shape: f32[16,32], index: 0, kind: input, shape index: {}]   ;;  %s2677_s1 = inlined_call_operand.vmem [shape: f32[64,32], index: 1, kind: input, shape index: {}]   ;;  %s2678_s2 = inlined_call_operand.vmem [shape: f32[16,4], index: 2, kind: input, shape index: {}]   ;;  %s2679_s3 = inlined_call_operand.vmem [shape: f32[64,1], index: 3, kind: input, shape index: {}]   ;;  %s2680_s4 = inlined_call_operand.vmem [shape: f32[32,32], index: 4, kind: input, shape index: {}]   ;;  %s2681_s5 = inlined_call_operand.vmem [shape: f32[32,8], index: 5, kind: input, shape index: {}]   ;;  %s2682_s6 = inlined_call_operand.vmem [shape: f32[32,8], index: 6, kind: input, shape index: {}]   ;;  %s2683_s7 = inlined_call_operand.<no memory space> [shape: f32[1,1], index: 7, kind: input, shape index: {}]   ;;  %s2684_s8 = inlined_call_operand.hbm [shape: f32[2,8,128], index: 8, kind: output, shape index: {}]  }
   0x1   :  { %13 = sst [smem:[#allocation4]] %s2683_s7 }
   0x2   :  { %14 = vsyncpa [#allocation6], 0 }
   0x3   :  { %16 = vsyncpa [#allocation6 + $0x1], 0  ;;  %s2134_s29 = smov 0   ;;  %s2136_s30 = smov 0  }
   0x4   :  { %s2138_s9 = smov 0   ;;  %s2140_s10 = smov 0  }
   0x5   :  { %s2142_s11 = smov 0   ;;  %s2144_s12 = smov 0  }
   0x6 LB: > { %s1689_s7 = sadd.s32 4294967295, %s2078_s12   ;;  %s1690_s13 = sadd.s32 4294967294, %s2078_s12   ;;  %s2078_s12 = sphi %s2144_s12, %s22_s12   ;;  %s2074_s11 = sphi %s2142_s11, %s2691_s11   ;;  %s2070_s10 = sphi %s2140_s10, %s2690_s10   ;;  %s2066_s9 = sphi %s2138_s9, %s2689_s9   ;;  %s2062_s30 = sphi %s2136_s30, %s2688_s30   ;;  %s2058_s29 = sphi %s2134_s29, %s2687_s29  }
   0x7   : > { %s34_s14 = sadd.s32 1, %s2074_s11  ;;  %s237_s15 = sadd.s32 1, %s2066_s9 }
   0x8   : > { %p36_p0 = scmp.ge.s32.totalorder %s34_s14, 2  ;;  %p247_p1 = scmp.ne.s32.totalorder %s2066_s9, %s2062_s30 }
   0x9   : > { %p248_p2 = scmp.eq.s32.totalorder %s1689_s7, 1  ;;  %p253_p3 = scmp.ne.s32.totalorder %s2062_s30, %s2058_s29 }
   0xa   : > { %s2693_s14 = smov (%p36_p0, %s34_s14), 0  ;;  %p254_p5 = scmp.eq.s32.totalorder %s1690_s13, 1 }
   0xb   : > { %p2174_p4 = por %p248_p2, %p247_p1  ;;  %s234_s17 = ssub.s32 %s2074_s11, %s2693_s14 }
   0xc   : > { %p1693_p6 = scmp.ge.s32.totalorder %s2078_s12, 1  ;;  %p235_p7 = scmp.eq.s32.totalorder %s234_s17, 0 }
   0xd   : > { %p2181_p8 = por %p254_p5, %p253_p3  ;;  %p324_p9 = scmp.lt.s32.totalorder %s2078_s12, 3 }
   0xe   : > { %s2187_s19 = scalar_select %p235_p7, %s2066_s9, %s237_s15  }
   0xf   : > { %p325_p10 = pnand %p1693_p6, %p324_p9 }
  0x10   : > { %v424_v0 = vld [vmem:[%s2680_s4] sm:$0xff] (!%p325_p10)  ;;  %v425_v1 = vld [vmem:[%s2680_s4 + $0x8] sm:$0xff] (!%p325_p10)  ;;  %v426_v2 = vld [vmem:[%s2680_s4 + $0x10] sm:$0xff] (!%p325_p10)  ;;  %vm407_vm0 = vcmask (!%p325_p10), 0   ;;  %v2080_v3 = vmov (!%p325_p10), 0.0|0.0   ;;  %v2081_v6 = vmov (!%p325_p10), 0.0   ;;  %v611_v29 = vlaneseq (!%p325_p10) }
  0x11   : > { %328 = sbr.rel (%p325_p10) target bundleno = 1518 (0x5ee), region = 52  ;;  %1793 = vmatprep.subr.bf16.mxu0 (!%p325_p10), %v2080_v3  ;;  %v1794_v4 = vpack.c.bf16 (!%p325_p10), %v425_v1, %v424_v0  ;;  %v427_v5 = vld [vmem:[%s2680_s4 + $0x18] sm:$0xff] (!%p325_p10)  ;;  %408 = vst.msk [vmem:[#allocation2] sm:$0x1] (!%p325_p10), %vm407_vm0, %v2081_v6  ;;  %409 = vst.msk [vmem:[#allocation3] sm:$0x1] (!%p325_p10), %vm407_vm0, %v2081_v6 }
  0x12   : > { %p376_p11 = scmp.lt.s32.totalorder (!%p325_p10), %s2070_s10, 1  ;;  %v1797_v7 = vpack.c.bf16 (!%p325_p10), %v427_v5, %v426_v2  ;;  %vm2082_vm1 = vmmov (!%p325_p10), 0   ;;  %s1696_s28 = sshll.u32 (!%p325_p10), %s2070_s10, 2  ;;  %v1179_v8 = vld [vmem:[%s2682_s6] sm:$0xff] (!%p325_p10)  ;;  %v1180_v9 = vld [vmem:[%s2682_s6 + $0x8] sm:$0xff] (!%p325_p10)  ;;  %vm428_vm2 = vcmask (!%p325_p10), 261120  }
  0x13   : > { %1751 = vmatprep.mubr.msk.f32.mxu0 (!%p325_p10), %vm2082_vm1, %v2081_v6  ;;  %1795 = vmatpush3.bf16.msra.mxu0 (!%p325_p10), %v1794_v4  ;;  %p383_p12 = scmp.lt.s32.totalorder (!%p325_p10), %s1696_s28, 7  ;;  %v688_v10 = vld [vmem:[%s2681_s5] sm:$0xff] (!%p325_p10)  ;;  %v689_v11 = vld [vmem:[%s2681_s5 + $0x8] sm:$0xff] (!%p325_p10)  ;;  %v1813_v12 = vpack.c.bf16 (!%p325_p10), %v1180_v9, %v1179_v8  ;;  %v690_v15 = vld [vmem:[%s2681_s5 + $0x10] sm:$0xff] (!%p325_p10)  ;;  %s410_s20 = sld [smem:[#allocation4]] (!%p325_p10)  ;;  %v2266_v31 = vshrl.u32 (!%p325_p10), %v611_v29, 7 }
  0x14   : > { %1800 = vmatprep.subr.bf16.mxu1 (!%p325_p10), %v1794_v4  ;;  %1796 = vmatprep.subr.bf16.mxu0 (!%p325_p10), %v2080_v3  ;;  %v1808_v14 = vpack.c.bf16 (!%p325_p10), %v689_v11, %v688_v10  ;;  %v691_v16 = vld [vmem:[%s2681_s5 + $0x18] sm:$0xff] (!%p325_p10)  ;;  %v1181_v22 = vld [vmem:[%s2682_s6 + $0x10] sm:$0xff] (!%p325_p10)  ;;  %v2083_v27 = vmov (!%p325_p10), 1966171168   ;;  %vm875_vm3 = vcmask (!%p325_p10), 257024   ;;  %vm768_vm4 = vcmask (!%p325_p10), 64512  }
  0x15   : > { %1802 = vmatpush3.bf16.msra.mxu1 (!%p325_p10), %v1794_v4  ;;  %v1811_v20 = vpack.c.bf16 (!%p325_p10), %v691_v16, %v690_v15  ;;  %v1182_v23 = vld [vmem:[%s2682_s6 + $0x18] sm:$0xff] (!%p325_p10)  ;;  %v609_v28 = vunpack.c.l.s4 (!%p325_p10), %v2083_v27  ;;  %v2270_v44 = vsub.s32 (!%p325_p10), 0, %v2266_v31  ;;  %vm1055_vm5 = vcmask (!%p325_p10), 1041409   ;;  %s372_s17 = sand.u32 (!%p325_p10), 1, %s2062_s30  }
  0x16   : > { %1804 = vmatprep.subr.bf16.mxu1 (!%p325_p10), %v1797_v7  ;;  %v1817_v24 = vpack.c.bf16 (!%p325_p10), %v1182_v23, %v1181_v22  ;;  %vm1057_vm6 = vcmask (!%p325_p10), 1042434   ;;  %vm1059_vm7 = vcmask (!%p325_p10), 1043459   ;;  %vm1061_vm8 = vcmask (!%p325_p10), 1044484  }
  0x17   : > { %1798 = vmatpush3.bf16.msra.mxu0 (!%p325_p10), %v1797_v7  ;;  %v610_v30 = vunpack.c.0.s8 (!%p325_p10), %v609_v28  ;;  %vm1063_vm9 = vcmask (!%p325_p10), 1045509   ;;  %vm1065_vm10 = vcmask (!%p325_p10), 1046534   ;;  %vm1067_vm11 = vcmask (!%p325_p10), 1047559  }
  0x18   : > { %s2210_s15 = scalar_select %p376_p11, %s2070_s10, 1  ;;  %1807 = vmatprep.subr.bf16.mxu0 %v2080_v3  ;;  %vm1496_vm12 = vcmask 7168   ;;  %vm1481_vm13 = vcmask 31744   ;;  %vm1544_vm14 = vcmp.eq.s32.totalorder %v2266_v31, 0 }
  0x19   : > { %s2695_s28 = smov (!%p383_p12, %s1696_s28), 7  ;;  %1806 = vmatpush3.bf16.msra.mxu1 %v1797_v7  ;;  %v411_v25 = vstv %s410_s20  ;;  %v613_v32 = vsub.s32 %v610_v30, %v2266_v31  ;;  %s1694_s20 = sshll.u32 %s372_s17, 3 }
  0x1a   : > { %s1695_s25 = sshll.u32 %s2210_s15, 3  ;;  %s1697_s22 = sshll.u32 %s2695_s28, 3  ;;  %1814 = vmatprep.subr.bf16.mxu1 %v1813_v12  ;;  %1896 = vrcp.f32 %v411_v25 }
  0x1b   : > { %s379_s7 = scalar_lea.vmem %s2676_s0, %s1695_s25  ;;  %s386_s26 = scalar_lea.vmem %s2677_s1, %s1697_s22 }
  0x1c   : > { %v414_v13 = vld [vmem:[%s379_s7] sm:$0xff]  ;;  %v2244_v18 = vld [vmem:[%s386_s26 + $0x8] sm:$0xff]  ;;  %v2246_v19 = vld [vmem:[%s386_s26 + $0x10] sm:$0xff]  ;;  %s393_s27 = scalar_lea.vmem %s2678_s2, %s1695_s25  ;;  %s374_s23 = scalar_lea.vmem [#allocation5], %s1694_s20 }
  0x1d   : > { %1752 = vmatmul.mubr.msk.f32.vlgmr.msra.gmra.mrb[0].mxu0 %vm428_vm2, %v414_v13  ;;  %v2242_v17 = vld [vmem:[%s386_s26] sm:$0xff]  ;;  %v2255_v21 = vld [vmem:[%s386_s26 + $0x18] sm:$0xff]  ;;  %v607_v33 = vcombine.high %v414_v13, %v414_v13  ;;  %v614_v34 = vrot.slane %v414_v13, %v613_v32  ;;  %v600_v23 = vcombine.high %v2244_v18, %v2244_v18  ;;  %s400_s26 = scalar_lea.vmem %s2679_s3, %s1697_s22  ;;  %s1586_s24 = sshll.u32 %s374_s23, 4  ;;  %s2631_s24 = int_to_ptr.vmem [resolvable:$true] %s1586_s24 }
  0x1e   : > { %1809 = vmatpush3.bf16.msra.mxu0 %v1808_v14  ;;  %1776 = vmatprep.mubr.msk.f32.mxu0 %vm2082_vm1, %v2081_v6  ;;  %v599_v9 = vcombine.high %v2242_v17, %v2242_v17 }
  0x1f   : > { %1762 = vmatprep.mubr.msk.f32.mxu1 %vm428_vm2, %v2242_v17  ;;  %1810 = vmatprep.subr.bf16.mxu0 %v2080_v3  ;;  %v621_v35 = vrot.slane %v607_v33, %v613_v32  ;;  %v622_v36 = vcombine.high %v614_v34, %v614_v34  ;;  %v630_v38 = vrot.slane %v614_v34, %v613_v32 }
  0x20   : > { %1763 = vmatmul.mubr.msk.f32.vlgmr.msra.gmra.mrb[0].mxu1 %vm428_vm2, %v2244_v18 }
  0x21   : > { %1765 = vmatprep.mubr.msk.f32.mxu1 %vm428_vm2, %v2246_v19  ;;  %1816 = vmatpush3.bf16.msra.mxu1 %v1813_v12  ;;  %v623_v37 = vcombine.high %v621_v35, %v621_v35  ;;  %v644_v39 = vrot.slane %v622_v36, %v613_v32  ;;  %v652_v40 = vcombine.high %v630_v38, %v630_v38 }
  0x22   : > { %1812 = vmatpush3.bf16.msra.mxu0 %v1811_v20  ;;  %1818 = vmatprep.subr.bf16.mxu1 %v1817_v24  ;;  %v637_v42 = vrot.slane %v621_v35, %v613_v32  ;;  %v659_v49 = vrot.slane %v630_v38, %v2270_v44 }
  0x23   : > { %v654_v41 = vcombine.high %v644_v39, %v644_v39  ;;  %v651_v43 = vrot.slane %v623_v37, %v613_v32  ;;  %v667_v45 = vrot.slane %v652_v40, %v2270_v44  ;;  %v663_v50 = vrot.slane %v644_v39, %v2270_v44 }
  0x24   : > { %1766 = vmatmul.mubr.msk.f32.gmra.mrb[2].mxu1 %vm428_vm2, %v2255_v21  ;;  %v1897_v26 = vpop.eup %1896  ;;  %v653_v47 = vcombine.high %v637_v42, %v637_v42  ;;  %v675_v51 = vrot.slane %v637_v42, %v2270_v44  ;;  %v602_v42 = vcombine.high %v2255_v21, %v2255_v21 }
  0x25   : > { %1820 = vmatpush3.bf16.msra.mxu1 %v1817_v24  ;;  %1821 = vpush %v1897_v26  ;;  %v671_v46 = vrot.slane %v654_v41, %v2270_v44  ;;  %v655_v48 = vcombine.high %v651_v43, %v651_v43  ;;  %v679_v56 = vrot.slane %v651_v43, %v2270_v44 }
  0x26   : > { %v683_v54 = vrot.slane %v653_v47, %v2270_v44  ;;  %v1324_v60 = vcombine.low %v659_v49, %v663_v50 }
  0x27   : > { %v1325_v53 = vcombine.low %v667_v45, %v671_v46  ;;  %v687_v55 = vrot.slane %v655_v48, %v2270_v44  ;;  %v1326_v4 = vcombine.low %v675_v51, %v679_v56 }
  0x29   : > { %v1327_v3 = vcombine.low %v683_v54, %v687_v55 }
  0x56   : > { %s1822_s21 = spop %1821 }
  0x57   : > { %v2329_v56 = vstv %s1822_s21  ;;  %s1714_s21 = sshll.u32 %s2070_s10, 7  ;;  %s2000_s10 = scalar_lea.vmem %s2631_s24, 128 }
  0x58   : > { %s2629_s22 = scalar_lea.hbm %s2684_s8, %s1714_s21  ;;  %p2001_p13 = scmp.ne.s32.totalorder %s2631_s24, %s2000_s10 }
  0x5a   : > { %p2002_p0 = pnand %p2001_p13, %p2174_p4 }
  0x5c   : > { %p2003_p1 = pneg %p2002_p0 }
  0xf0   : > { %v498_v52 = vpop.f32.mrb[0].mxu0 }
  0xf1   : > { %v778_v57 = vcombine.high %v498_v52, %v498_v52  ;;  %v785_v58 = vrot.slane %v498_v52, %v613_v32  ;;  %v1753_v59 = vpop.f32.mrb[1].mxu0  ;;  %1777 = vmatmul.mubr.msk.f32.vlgmr.msra.gmra.mrb[2].mxu0 %vm428_vm2, %v498_v52 }
  0xf2   : > { %v2084_v59 = vmov 0  }
  0xf3   : > { %v792_v61 = vrot.slane %v778_v57, %v613_v32  ;;  %v793_v62 = vcombine.high %v785_v58, %v785_v58  ;;  %v801_v63 = vrot.slane %v785_v58, %v613_v32  ;;  %v1764_v0 = vpop.f32.mrb[0].mxu1  ;;  %1890 = vset.pattern.permute.xlu0 %v2084_v59  ;;  %1889 = vset.pattern.permute.xlu1 %v2084_v59 }
  0xf4   : > { %v2281_v1 = vmul.f32 %v1764_v0, %v1325_v53  ;;  %v580_v2 = vpop.f32.mrb[1].mxu1 }
  0xf5   : > { %v794_v5 = vcombine.high %v792_v61, %v792_v61  ;;  %v2283_v6 = vmul.f32 %v1324_v60, %v580_v2  ;;  %1787 = vmatprep.mubr.msk.f32.mxu1 %vm428_vm2, %v580_v2  ;;  %v830_v7 = vrot.slane %v801_v63, %v2270_v44  ;;  %v823_v8 = vcombine.high %v801_v63, %v801_v63 }
  0xf6   : > { %1788 = vmatmul.mubr.msk.f32.vlgmr.msra.gmra.mrb[4].mxu1 %vm428_vm2, %v1764_v0  ;;  %v815_v10 = vrot.slane %v793_v62, %v613_v32  ;;  %v808_v11 = vrot.slane %v792_v61, %v613_v32 }
  0xf7   : > { %v1767_v12 = vpop.f32.mrb[2].mxu1  ;;  %v867_v13 = vmul.f32 %v830_v7, %v2242_v17  ;;  %v838_v14 = vrot.slane %v823_v8, %v2270_v44  ;;  %v822_v15 = vrot.slane %v794_v5, %v613_v32  ;;  %v601_v32 = vcombine.high %v2246_v19, %v2246_v19 }
  0xf8   : > { %v2292_v16 = vmul.f32 %v1767_v12, %v1327_v3  ;;  %v590_v20 = vpop.f32.mrb[3].mxu1  ;;  %v834_v22 = vrot.slane %v815_v10, %v2270_v44  ;;  %v825_v24 = vcombine.high %v815_v10, %v815_v10  ;;  %v846_v27 = vrot.slane %v808_v11, %v2270_v44 }
  0xf9   : > { %v2297_v25 = vmul.f32 %v1326_v4, %v590_v20  ;;  %1790 = vmatprep.mubr.msk.f32.mxu1 %vm428_vm2, %v590_v20  ;;  %v876_v26 = vsel %vm875_vm3, %v867_v13, 0.0  ;;  %v869_v17 = vmul.f32 %v838_v14, %v2244_v18  ;;  %v850_v34 = vrot.slane %v822_v15, %v2270_v44 }
  0xfa   : > { %1791 = vmatmul.mubr.msk.f32.gmra.mrb[6].mxu1 %vm428_vm2, %v1767_v12  ;;  %877 = vadd.xlane.f32.xlu0 %v876_v26  ;;  %v868_v28 = vmul.f32 %v834_v22, %v599_v9  ;;  %v842_v30 = vrot.slane %v825_v24, %v2270_v44  ;;  %v824_v35 = vcombine.high %v808_v11, %v808_v11  ;;  %v923_v4 = vsub.s32 1, %v2266_v31 }
  0xfb   : > { %v882_v33 = vsel %vm875_vm3, %v869_v17, 0.0  ;;  %v826_v36 = vcombine.high %v822_v15, %v822_v15  ;;  %v871_v38 = vmul.f32 %v846_v27, %v2246_v19  ;;  %v872_v41 = vmul.f32 %v850_v34, %v601_v32 }
  0xfc   : > { %883 = vadd.xlane.f32.xlu1 %v882_v33  ;;  %v870_v37 = vmul.f32 %v842_v30, %v600_v23  ;;  %v879_v18 = vsel %vm875_vm3, %v868_v28, 0.0  ;;  %v854_v39 = vrot.slane %v824_v35, %v2270_v44  ;;  %v927_v7 = vsub.s32 2, %v2266_v31 }
  0xfd   : > { %v858_v43 = vrot.slane %v826_v36, %v2270_v44  ;;  %v888_v45 = vsel %vm875_vm3, %v871_v38, 0.0  ;;  %v891_v47 = vsel %vm875_vm3, %v872_v41, 0.0  ;;  %v931_v23 = vsub.s32 3, %v2266_v31 }
  0xfe   : > { %880 = vadd.xlane.f32.xlu0 %v879_v18  ;;  %v885_v40 = vsel %vm875_vm3, %v870_v37, 0.0  ;;  %v873_v46 = vmul.f32 %v854_v39, %v2255_v21  ;;  %v935_v28 = vsub.s32 4, %v2266_v31  ;;  %v939_v36 = vsub.s32 5, %v2266_v31 }
  0xff   : > { %v874_v19 = vmul.f32 %v858_v43, %v602_v42 }
 0x100   : > { %886 = vadd.xlane.f32.xlu1 %v885_v40  ;;  %v894_v48 = vsel %vm875_vm3, %v873_v46, 0.0  ;;  %v943_v40 = vsub.s32 6, %v2266_v31  ;;  %v947_v46 = vsub.s32 7, %v2266_v31 }
 0x101   : > { %v897_v49 = vsel %vm875_vm3, %v874_v19, 0.0 }
 0x102   : > { %889 = vadd.xlane.f32.xlu0 %v888_v45 }
 0x104   : > { %892 = vadd.xlane.f32.xlu1 %v891_v47 }
 0x106   : > { %895 = vadd.xlane.f32.xlu0 %v894_v48 }
 0x108   : > { %898 = vadd.xlane.f32.xlu1 %v897_v49 }
 0x187   : > { %v878_v60 = vpop.xlane.xlu0 %877 }
 0x189   : > { %v884_v62 = vpop.xlane.xlu1 %883 }
 0x18b   : > { %v881_v61 = vpop.xlane.xlu0 %880 }
 0x18d   : > { %v887_v0 = vpop.xlane.xlu1 %886 }
 0x18f   : > { %v890_v63 = vpop.xlane.xlu0 %889 }
 0x191   : > { %v893_v9 = vpop.xlane.xlu1 %892 }
 0x193   : > { %v896_v2 = vpop.xlane.xlu0 %895 }
 0x195   : > { %v899_v30 = vpop.xlane.xlu1 %898 }
 0x1c4   : > { %v761_v50 = vpop.f32.mrb[2].mxu0 }
 0x1c5   : > { %1898 = vtanh.f32 %v761_v50  ;;  %v1778_v51 = vpop.f32.mrb[3].mxu0 }
 0x1c6   : > { %1900 = vtanh.f32 %v878_v60 }
 0x1c7   : > { %1902 = vtanh.f32 %v881_v61 }
 0x1c8   : > { %1904 = vtanh.f32 %v884_v62 }
 0x1c9   : > { %v2321_v52 = vpop.f32.mrb[4].mxu1  ;;  %1906 = vtanh.f32 %v887_v0 }
 0x1ca   : > { %v2323_v53 = vpop.f32.mrb[5].mxu1  ;;  %1908 = vtanh.f32 %v890_v63 }
 0x1cb   : > { %1910 = vtanh.f32 %v893_v9 }
 0x1cc   : > { %1912 = vtanh.f32 %v896_v2 }
 0x1cd   : > { %v2325_v21 = vpop.f32.mrb[6].mxu1  ;;  %1914 = vtanh.f32 %v899_v30 }
 0x1ce   : > { %v2327_v54 = vpop.f32.mrb[7].mxu1  ;;  %1916 = vtanh.f32 %v2323_v53 }
 0x1cf   : > { %v1899_v55 = vpop.eup %1898  ;;  %1918 = vtanh.f32 %v2327_v54 }
 0x1d0   : > { %v2332_v57 = vmul.f32 %v1899_v55, %v2329_v56  ;;  %v1901_v3 = vpop.eup %1900  ;;  %1920 = vtanh.f32 %v2321_v52 }
 0x1d1   : > { %v1903_v5 = vpop.eup %1902  ;;  %v2347_v12 = vmul.f32 %v1901_v3, %v2329_v56 }
 0x1d2   : > { %v769_v58 = vsel %vm768_vm4, %v2332_v57, -inf  ;;  %v2341_v10 = vmul.f32 %v1903_v5, %v2329_v56  ;;  %v1905_v14 = vpop.eup %1904 }
 0x1d3   : > { %770 = vmax.xlane.f32.xlu0 %v769_v58  ;;  %v2364_v24 = vmul.f32 %v1905_v14, %v2329_v56  ;;  %v1907_v26 = vpop.eup %1906 }
 0x1d4   : > { %v2375_v32 = vmul.f32 %v1907_v26, %v2329_v56  ;;  %v1909_v33 = vpop.eup %1908  ;;  %v2452_v26 = vand.u32 127, %v611_v29 }
 0x1d5   : > { %v2386_v37 = vmul.f32 %v1909_v33, %v2329_v56  ;;  %v1911_v18 = vpop.eup %1910 }
 0x1d6   : > { %v2397_v41 = vmul.f32 %v1911_v18, %v2329_v56  ;;  %v1913_v42 = vpop.eup %1912  ;;  %vm1548_vm15 = vcmp.eq.s32.totalorder %v2452_v26, 1  ;;  %vm1545_vm1 = vcmp.eq.s32.totalorder %v2452_v26, 0 }
 0x1d7   : > { %v2409_v47 = vmul.f32 %v1913_v42, %v2329_v56  ;;  %v1915_v19 = vpop.eup %1914  ;;  %vm1546_vm3 = vmand %vm1544_vm14, %vm1545_vm1 }
 0x1d8   : > { %v2420_v50 = vmul.f32 %v1915_v19, %v2329_v56  ;;  %v1917_v53 = vpop.eup %1916 }
 0x1d9   : > { %v2427_v54 = vmul.f32 %v1917_v53, %v2329_v56  ;;  %v1919_v55 = vpop.eup %1918 }
 0x1da   : > { %v2432_v59 = vmul.f32 %v1919_v55, %v2329_v56  ;;  %v1921_v63 = vpop.eup %1920 }
 0x1db   : > { %v1288_v58 = vsel %vm768_vm4, %v2427_v54, -inf  ;;  %v2442_v3 = vmul.f32 %v1921_v63, %v2329_v56 }
 0x1dc   : > { %v1294_v60 = vsel %vm768_vm4, %v2432_v59, -inf }
 0x1dd   : > { %v1291_v9 = vsel %vm768_vm4, %v2442_v3, -inf }
 0x260   : > { %v2338_v8 = vpop.xlane.xlu0 %770 }
 0x261   : > { %v924_v11 = vrot.slane %v2338_v8, %v923_v4  ;;  %v920_v13 = vrot.slane %v2338_v8, %v2270_v44  ;;  %v928_v22 = vrot.slane %v2338_v8, %v927_v7  ;;  %v932_v27 = vrot.slane %v2338_v8, %v931_v23 }
 0x262   : > { %v936_v35 = vrot.slane %v2338_v8, %v935_v28  ;;  %v940_v39 = vrot.slane %v2338_v8, %v939_v36  ;;  %v944_v45 = vrot.slane %v2338_v8, %v943_v40  ;;  %v948_v49 = vrot.slane %v2338_v8, %v947_v46 }
 0x263   : > { %v2352_v15 = vmax.f32 %v2341_v10, %v924_v11  ;;  %v2355_v20 = vmax.f32 %v2347_v12, %v920_v13  ;;  %v2367_v17 = vmax.f32 %v2364_v24, %v928_v22  ;;  %v2378_v34 = vmax.f32 %v2375_v32, %v932_v27 }
 0x264   : > { %v2389_v38 = vmax.f32 %v2386_v37, %v936_v35  ;;  %v2401_v43 = vmax.f32 %v2397_v41, %v940_v39  ;;  %v2413_v48 = vmax.f32 %v2409_v47, %v944_v45  ;;  %v2423_v51 = vmax.f32 %v2420_v50, %v948_v49 }
 0x265   : > { %1001 = vperm.xlu0 %1890, %v2352_v15   ;;  %998 = vperm.xlu1 %1889, %v2355_v20   ;;  %v772_v61 = vsub.f32 %v2332_v57, %v2338_v8  ;;  %v2456_v27 = vsub.s32 %v2452_v26, %v2266_v31 }
 0x267   : > { %v773_v62 = vmul.f32 1.442695, %v772_v61 }
 0x269   : > { %1004 = vperm.xlu1 %1889, %v2367_v17   ;;  %1922 = vpow2.f32 %v773_v62 }
 0x26a   : > { %1924 = vtanh.f32 %v2325_v21 }
 0x26d   : > { %1007 = vperm.xlu1 %1889, %v2378_v34  }
 0x271   : > { %1010 = vperm.xlu1 %1889, %v2389_v38  }
 0x273   : > { %v1923_v0 = vpop.eup %1922 }
 0x274   : > { %v775_v2 = vsel %vm768_vm4, %v1923_v0, 0.0  ;;  %v1925_v5 = vpop.eup %1924 }
 0x275   : > { %1013 = vperm.xlu1 %1889, %v2401_v43   ;;  %v2447_v57 = vmul.f32 %v1925_v5, %v2329_v56 }
 0x277   : > { %v1297_v52 = vsel %vm768_vm4, %v2447_v57, -inf }
 0x279   : > { %1016 = vperm.xlu1 %1889, %v2413_v48  }
 0x27d   : > { %1019 = vperm.xlu1 %1889, %v2423_v51  }
 0x284   : > { %1289 = vmax.xlane.f32.xlu0 %v1288_v58 }
 0x288   : > { %1295 = vmax.xlane.f32.xlu0 %v1294_v60 }
 0x2a1   : > { %776 = vadd.xlane.f32.xlu1 %v775_v2 }
 0x2a5   : > { %1292 = vmax.xlane.f32.xlu1 %v1291_v9 }
 0x2a9   : > { %1298 = vmax.xlane.f32.xlu1 %v1297_v52 }
 0x2e4   : > { %v999_v21 = vpop.permute.xlu1 %998  ;;  %v1002_v30 = vpop.permute.xlu0 %1001 }
 0x2e5   : > { %v1030_v35 = vrot.slane %v1002_v30, %v2456_v27  ;;  %v1026_v18 = vrot.slane %v999_v21, %v2456_v27 }
 0x2e7   : > { %v1056_v19 = vsel %vm1055_vm5, %v1030_v35, %v1026_v18 }
 0x2e8   : > { %v1005_v11 = vpop.permute.xlu1 %1004 }
 0x2e9   : > { %v1034_v39 = vrot.slane %v1005_v11, %v2456_v27 }
 0x2eb   : > { %v1058_v53 = vsel %vm1057_vm6, %v1034_v39, %v1056_v19 }
 0x2ec   : > { %v1008_v13 = vpop.permute.xlu1 %1007 }
 0x2ed   : > { %v1038_v42 = vrot.slane %v1008_v13, %v2456_v27 }
 0x2ef   : > { %v1060_v58 = vsel %vm1059_vm7, %v1038_v42, %v1058_v53  ;;  %v1342_v53 = vsel %vm428_vm2, %v2297_v25, 0.0  ;;  %v968_v25 = vsub.f32 %v2375_v32, %v2378_v34 }
 0x2f0   : > { %v1011_v14 = vpop.permute.xlu1 %1010 }
 0x2f1   : > { %v1042_v29 = vrot.slane %v1011_v14, %v2456_v27 }
 0x2f3   : > { %v1062_v61 = vsel %vm1061_vm8, %v1042_v29, %v1060_v58 }
 0x2f4   : > { %v1014_v22 = vpop.permute.xlu1 %1013 }
 0x2f5   : > { %v1046_v49 = vrot.slane %v1014_v22, %v2456_v27 }
 0x2f7   : > { %v1064_v62 = vsel %vm1063_vm9, %v1046_v49, %v1062_v61 }
 0x2f8   : > { %v1017_v33 = vpop.permute.xlu1 %1016 }
 0x2f9   : > { %v1050_v55 = vrot.slane %v1017_v33, %v2456_v27 }
 0x2fb   : > { %v1066_v63 = vsel %vm1065_vm10, %v1050_v55, %v1064_v62  ;;  %v966_v55 = vsub.f32 %v2341_v10, %v2352_v15 }
 0x2fc   : > { %v1020_v45 = vpop.permute.xlu1 %1019 }
 0x2fd   : > { %v1054_v60 = vrot.slane %v1020_v45, %v2456_v27  ;;  %v975_v61 = vmul.f32 1.442695, %v966_v55 }
 0x2ff   : > { %v1068_v0 = vsel %vm1067_vm11, %v1054_v60, %v1066_v63  ;;  %v965_v60 = vsub.f32 %v2347_v12, %v2355_v20 }
 0x300   : > { %v1070_v2 = vsub.f32 %v2338_v8, %v1068_v0 }
 0x301   : > { %v973_v63 = vmul.f32 1.442695, %v965_v60 }
 0x302   : > { %v1071_v5 = vmul.f32 1.442695, %v1070_v2  ;;  %v969_v2 = vsub.f32 %v2386_v37, %v2389_v38 }
 0x304   : > { %1926 = vpow2.f32 %v1071_v5  ;;  %v979_v5 = vmul.f32 1.442695, %v968_v25 }
 0x30e   : > { %v1927_v9 = vpop.eup %1926 }
 0x311   : > { %v2505_v29 = vpop.xlane.xlu0 %1289 }
 0x315   : > { %v2509_v45 = vpop.xlane.xlu0 %1295 }
 0x316   : > { %v1302_v19 = vsub.f32 %v2432_v59, %v2509_v45  ;;  %v967_v59 = vsub.f32 %v2364_v24, %v2367_v17 }
 0x318   : > { %v1308_v49 = vmul.f32 1.442695, %v1302_v19  ;;  %v977_v0 = vmul.f32 1.442695, %v967_v59 }
 0x32e   : > { %v777_v52 = vpop.xlane.xlu1 %776 }
 0x32f   : > { %v1073_v21 = vmul.f32 %v1927_v9, %v777_v52  ;;  %v970_v9 = vsub.f32 %v2397_v41, %v2401_v43  ;;  %v981_v52 = vmul.f32 1.442695, %v969_v2 }
 0x331   : > { %v1085_v11 = vrot.slane %v1073_v21, %v923_v4  ;;  %v1078_v13 = vrot.slane %v1073_v21, %v2270_v44  ;;  %v1092_v14 = vrot.slane %v1073_v21, %v927_v7  ;;  %v1099_v22 = vrot.slane %v1073_v21, %v931_v23 }
 0x332   : > { %v1106_v8 = vrot.slane %v1073_v21, %v935_v28  ;;  %v1113_v30 = vrot.slane %v1073_v21, %v939_v36  ;;  %v1120_v44 = vrot.slane %v1073_v21, %v943_v40  ;;  %v2487_v4 = vpop.xlane.xlu1 %1292  ;;  %v1339_v36 = vsel %vm428_vm2, %v2281_v1, 0.0 }
 0x333   : > { %1087 = vbcast.lane.b32.xlu1 %v1085_v11, 256  ;;  %1080 = vbcast.lane.b32.xlu0 %v1078_v13, 256  ;;  %v1301_v7 = vsub.f32 %v2442_v3, %v2487_v4  ;;  %v1336_v40 = vsel %vm428_vm2, %v2283_v6, 0.0  ;;  %v1345_v3 = vsel %vm428_vm2, %v2292_v16, 0.0  ;;  %v1127_v1 = vrot.slane %v1073_v21, %v947_v46  ;;  %vm1549_vm2 = vmand %vm1544_vm14, %vm1548_vm15 }
 0x334   : > { %v1300_v6 = vsub.f32 %v2427_v54, %v2505_v29  ;;  %v983_v21 = vmul.f32 1.442695, %v970_v9  ;;  %v971_v11 = vsub.f32 %v2409_v47, %v2413_v48 }
 0x335   : > { %v1306_v33 = vmul.f32 1.442695, %v1301_v7 }
 0x336   : > { %v2491_v23 = vpop.xlane.xlu1 %1298  ;;  %v1304_v16 = vmul.f32 1.442695, %v1300_v6  ;;  %v985_v13 = vmul.f32 1.442695, %v971_v11 }
 0x337   : > { %1094 = vbcast.lane.b32.xlu1 %v1092_v14, 256  ;;  %1101 = vbcast.lane.b32.xlu0 %v1099_v22, 256  ;;  %v1303_v28 = vsub.f32 %v2447_v57, %v2491_v23  ;;  %1928 = vpow2.f32 %v1306_v33 }
 0x339   : > { %v1310_v35 = vmul.f32 1.442695, %v1303_v28 }
 0x33b   : > { %1108 = vbcast.lane.b32.xlu1 %v1106_v8, 256  ;;  %1115 = vbcast.lane.b32.xlu0 %v1113_v30, 256  ;;  %1930 = vpow2.f32 %v1310_v35 }
 0x33c   : > { %1932 = vpow2.f32 %v1304_v16 }
 0x33d   : > { %1934 = vpow2.f32 %v1308_v49 }
 0x33e   : > { %1936 = vpow2.f32 %v975_v61 }
 0x33f   : > { %1122 = vbcast.lane.b32.xlu1 %v1120_v44, 256  ;;  %1938 = vpow2.f32 %v973_v63 }
 0x340   : > { %1940 = vpow2.f32 %v977_v0 }
 0x341   : > { %v1929_v18 = vpop.eup %1928  ;;  %1942 = vpow2.f32 %v979_v5 }
 0x342   : > { %v1315_v39 = vsel %vm768_vm4, %v1929_v18, 0.0  ;;  %1944 = vpow2.f32 %v981_v52 }
 0x343   : > { %1946 = vpow2.f32 %v983_v21 }
 0x344   : > { %1948 = vpow2.f32 %v985_v13 }
 0x345   : > { %v1931_v42 = vpop.eup %1930 }
 0x346   : > { %v1321_v57 = vsel %vm768_vm4, %v1931_v42, 0.0  ;;  %v1933_v46 = vpop.eup %1932 }
 0x347   : > { %v1312_v58 = vsel %vm768_vm4, %v1933_v46, 0.0  ;;  %v1935_v54 = vpop.eup %1934 }
 0x348   : > { %v1318_v62 = vsel %vm768_vm4, %v1935_v54, 0.0  ;;  %v1937_v14 = vpop.eup %1936 }
 0x349   : > { %v1939_v22 = vpop.eup %1938 }
 0x34a   : > { %v1941_v33 = vpop.eup %1940 }
 0x34b   : > { %v1943_v28 = vpop.eup %1942 }
 0x34c   : > { %v1945_v18 = vpop.eup %1944 }
 0x35a   : > { %1340 = vadd.xlane.f32.xlu0 %v1339_v36 }
 0x363   : > { %1337 = vadd.xlane.f32.xlu1 %v1336_v40 }
 0x367   : > { %1346 = vadd.xlane.f32.xlu1 %v1345_v3 }
 0x36b   : > { %1316 = vadd.xlane.f32.xlu1 %v1315_v39  ;;  %v1947_v39 = vpop.eup %1946 }
 0x36c   : > { %v1949_v16 = vpop.eup %1948 }
 0x36f   : > { %1322 = vadd.xlane.f32.xlu1 %v1321_v57 }
 0x370   : > { %1129 = vbcast.lane.b32.xlu0 %v1127_v1, 256 }
 0x38f   : > { %1343 = vadd.xlane.f32.xlu0 %v1342_v53 }
 0x393   : > { %1313 = vadd.xlane.f32.xlu0 %v1312_v58 }
 0x397   : > { %1319 = vadd.xlane.f32.xlu0 %v1318_v62 }
 0x3a5   : > { %v1081_v8 = vpop.permute.xlu0 %1080  ;;  %v1088_v30 = vpop.permute.xlu1 %1087 }
 0x3a6   : > { %v1139_v44 = vadd.f32 %v1939_v22, %v1081_v8  ;;  %v1140_v7 = vadd.f32 %v1937_v14, %v1088_v30 }
 0x3a8   : > { %1950 = vlog2.f32 %v1139_v44 }
 0x3a9   : > { %1952 = vlog2.f32 %v1140_v7  ;;  %v1102_v36 = vpop.permute.xlu0 %1101  ;;  %v1095_v35 = vpop.permute.xlu1 %1094 }
 0x3aa   : > { %v1142_v40 = vadd.f32 %v1943_v28, %v1102_v36  ;;  %v1141_v3 = vadd.f32 %v1941_v33, %v1095_v35 }
 0x3ac   : > { %1954 = vlog2.f32 %v1142_v40 }
 0x3ad   : > { %1956 = vlog2.f32 %v1141_v3  ;;  %v1116_v42 = vpop.permute.xlu0 %1115  ;;  %v1109_v57 = vpop.permute.xlu1 %1108 }
 0x3ae   : > { %v1144_v1 = vadd.f32 %v1947_v39, %v1116_v42  ;;  %v1143_v6 = vadd.f32 %v1945_v18, %v1109_v57 }
 0x3b0   : > { %1958 = vlog2.f32 %v1144_v1 }
 0x3b1   : > { %1960 = vlog2.f32 %v1143_v6  ;;  %v1123_v19 = vpop.permute.xlu1 %1122 }
 0x3b2   : > { %v1951_v49 = vpop.eup %1950  ;;  %v1145_v53 = vadd.f32 %v1949_v16, %v1123_v19 }
 0x3b3   : > { %v1953_v46 = vpop.eup %1952  ;;  %v1148_v55 = vmul.f32 0.6931472, %v1951_v49 }
 0x3b4   : > { %v1150_v58 = vmul.f32 0.6931472, %v1953_v46  ;;  %1962 = vlog2.f32 %v1145_v53 }
 0x3b5   : > { %v1163_v54 = vadd.f32 %v1148_v55, %v2355_v20 }
 0x3b6   : > { %v1955_v60 = vpop.eup %1954  ;;  %v1164_v61 = vadd.f32 %v1150_v58, %v2352_v15 }
 0x3b7   : > { %v1957_v59 = vpop.eup %1956  ;;  %v1154_v62 = vmul.f32 0.6931472, %v1955_v60  ;;  %v1171_v63 = vsub.f32 %v1163_v54, %v2347_v12 }
 0x3b8   : > { %v1152_v25 = vmul.f32 0.6931472, %v1957_v59  ;;  %v1172_v0 = vsub.f32 %v1164_v61, %v2341_v10 }
 0x3b9   : > { %v1166_v2 = vadd.f32 %v1154_v62, %v2378_v34  ;;  %1417 = vperm.xlu0 %1890, %v1171_v63  }
 0x3ba   : > { %v1959_v5 = vpop.eup %1958  ;;  %v1165_v9 = vadd.f32 %v1152_v25, %v2367_v17  ;;  %1420 = vperm.xlu1 %1889, %v1172_v0  }
 0x3bb   : > { %v1961_v52 = vpop.eup %1960  ;;  %v1158_v21 = vmul.f32 0.6931472, %v1959_v5  ;;  %v1174_v20 = vsub.f32 %v1166_v2, %v2375_v32 }
 0x3bc   : > { %v1156_v11 = vmul.f32 0.6931472, %v1961_v52  ;;  %v1173_v15 = vsub.f32 %v1165_v9, %v2364_v24  ;;  %v972_v24 = vsub.f32 %v2420_v50, %v2423_v51 }
 0x3bd   : > { %v1168_v13 = vadd.f32 %v1158_v21, %v2401_v43  ;;  %1426 = vperm.xlu0 %1890, %v1174_v20  }
 0x3be   : > { %v1963_v12 = vpop.eup %1962  ;;  %v1167_v10 = vadd.f32 %v1156_v11, %v2389_v38  ;;  %1423 = vperm.xlu1 %1889, %v1173_v15   ;;  %v987_v43 = vmul.f32 1.442695, %v972_v24 }
 0x3bf   : > { %v1160_v34 = vmul.f32 0.6931472, %v1963_v12  ;;  %v1176_v14 = vsub.f32 %v1168_v13, %v2397_v41 }
 0x3c0   : > { %v1175_v17 = vsub.f32 %v1167_v10, %v2386_v37  ;;  %1964 = vpow2.f32 %v987_v43 }
 0x3c1   : > { %v1169_v22 = vadd.f32 %v1160_v34, %v2413_v48  ;;  %1432 = vperm.xlu0 %1890, %v1176_v14  }
 0x3c2   : > { %1429 = vperm.xlu1 %1889, %v1175_v17  }
 0x3c3   : > { %v1177_v32 = vsub.f32 %v1169_v22, %v2409_v47 }
 0x3c6   : > { %1435 = vperm.xlu1 %1889, %v1177_v32  }
 0x3ca   : > { %v1965_v38 = vpop.eup %1964 }
 0x3e7   : > { %v1341_v8 = vpop.xlane.xlu0 %1340 }
 0x3eb   : > { %v1130_v30 = vpop.permute.xlu0 %1129 }
 0x3ec   : > { %v1146_v44 = vadd.f32 %v1965_v38, %v1130_v30 }
 0x3ee   : > { %1966 = vlog2.f32 %v1146_v44 }
 0x3ef   : > { %1968 = vtanh.f32 %v1341_v8 }
 0x3f0   : > { %v1338_v48 = vpop.xlane.xlu1 %1337 }
 0x3f1   : > { %1970 = vtanh.f32 %v1338_v48  ;;  %v420_v48 = vld [vmem:[%s400_s26] sm:$0xff] }
 0x3f4   : > { %v1347_v47 = vpop.xlane.xlu1 %1346 }
 0x3f5   : > { %1972 = vtanh.f32 %v1347_v47 }
 0x3f8   : > { %v1967_v41 = vpop.eup %1966  ;;  %v1317_v62 = vpop.xlane.xlu1 %1316 }
 0x3f9   : > { %v1162_v7 = vmul.f32 0.6931472, %v1967_v41  ;;  %v1969_v28 = vpop.eup %1968 }
 0x3fa   : > { %v2550_v35 = vmul.f32 %v1969_v28, %v2329_v56 }
 0x3fb   : > { %v1170_v37 = vadd.f32 %v1162_v7, %v2423_v51  ;;  %v1971_v36 = vpop.eup %1970 }
 0x3fc   : > { %v2553_v40 = vmul.f32 %v1971_v36, %v2329_v56  ;;  %v2557_v51 = vmax.f32 %v2550_v35, %v2487_v4  ;;  %v1323_v15 = vpop.xlane.xlu1 %1322  ;;  %v421_v36 = vld [vmem:[%s400_s26 + $0x8] sm:$0xff] }
 0x3fd   : > { %v1178_v33 = vsub.f32 %v1170_v37, %v2420_v50 }
 0x3fe   : > { %v1356_v18 = vmax.f32 %v2553_v40, %v2505_v29  ;;  %v1373_v39 = vsub.f32 %v2487_v4, %v2557_v51  ;;  %v1361_v53 = vsub.f32 %v2550_v35, %v2557_v51 }
 0x3ff   : > { %1438 = vperm.xlu0 %1890, %v1178_v33   ;;  %v1973_v3 = vpop.eup %1972 }
 0x400   : > { %v2560_v50 = vmul.f32 %v1973_v3, %v2329_v56  ;;  %v1372_v57 = vsub.f32 %v2505_v29, %v1356_v18  ;;  %v1378_v1 = vmul.f32 1.442695, %v1373_v39  ;;  %v1360_v6 = vsub.f32 %v2553_v40, %v1356_v18 }
 0x401   : > { %v1366_v55 = vmul.f32 1.442695, %v1361_v53 }
 0x402   : > { %v2568_v42 = vmax.f32 %v2560_v50, %v2491_v23  ;;  %v1376_v19 = vmul.f32 1.442695, %v1372_v57  ;;  %v1364_v4 = vmul.f32 1.442695, %v1360_v6  ;;  %v1515_v6 = vsel %vm1496_vm12, %v421_v36, 0.0 }
 0x404   : > { %v1375_v16 = vsub.f32 %v2491_v23, %v2568_v42  ;;  %v1363_v29 = vsub.f32 %v2560_v50, %v2568_v42 }
 0x406   : > { %v1382_v46 = vmul.f32 1.442695, %v1375_v16  ;;  %v1370_v58 = vmul.f32 1.442695, %v1363_v29  ;;  %v422_v16 = vld [vmem:[%s400_s26 + $0x10] sm:$0xff] }
 0x41c   : > { %v1344_v49 = vpop.xlane.xlu0 %1343 }
 0x41d   : > { %1974 = vtanh.f32 %v1344_v49 }
 0x41e   : > { %1976 = vpow2.f32 %v1378_v1 }
 0x41f   : > { %1978 = vpow2.f32 %v1376_v19 }
 0x420   : > { %1980 = vpow2.f32 %v1364_v4  ;;  %v1314_v23 = vpop.xlane.xlu0 %1313 }
 0x421   : > { %1982 = vpow2.f32 %v1382_v46  ;;  %v1517_v46 = vsel %vm1496_vm12, %v422_v16, 0.0 }
 0x422   : > { %1984 = vpow2.f32 %v1366_v55 }
 0x423   : > { %1986 = vpow2.f32 %v1370_v58 }
 0x424   : > { %v1320_v17 = vpop.xlane.xlu0 %1319 }
 0x427   : > { %v1975_v54 = vpop.eup %1974 }
 0x428   : > { %v1977_v60 = vpop.eup %1976  ;;  %v1354_v61 = vmul.f32 %v1975_v54, %v2329_v56 }
 0x429   : > { %v1979_v59 = vpop.eup %1978  ;;  %v1385_v2 = vmul.f32 %v1977_v60, %v1317_v62 }
 0x42a   : > { %v1384_v63 = vmul.f32 %v1979_v59, %v1314_v23  ;;  %v1358_v25 = vmax.f32 %v1354_v61, %v2509_v45  ;;  %v1981_v0 = vpop.eup %1980 }
 0x42b   : > { %v1983_v52 = vpop.eup %1982 }
 0x42c   : > { %v1362_v5 = vsub.f32 %v1354_v61, %v1358_v25  ;;  %v1374_v9 = vsub.f32 %v2509_v45, %v1358_v25  ;;  %v1388_v21 = vadd.f32 %v1981_v0, %v1384_v63  ;;  %v1985_v11 = vpop.eup %1984  ;;  %v1387_v10 = vmul.f32 %v1983_v52, %v1323_v15 }
 0x42d   : > { %v1389_v12 = vadd.f32 %v1985_v11, %v1385_v2  ;;  %v1987_v56 = vpop.eup %1986 }
 0x42e   : > { %v1380_v20 = vmul.f32 1.442695, %v1374_v9  ;;  %v1368_v13 = vmul.f32 1.442695, %v1362_v5  ;;  %v1391_v34 = vadd.f32 %v1987_v56, %v1387_v10 }
 0x430   : > { %1988 = vpow2.f32 %v1380_v20 }
 0x431   : > { %1990 = vlog2.f32 %v1388_v21 }
 0x432   : > { %1992 = vpow2.f32 %v1368_v13 }
 0x433   : > { %1994 = vlog2.f32 %v1389_v12 }
 0x434   : > { %1996 = vlog2.f32 %v1391_v34 }
 0x438   : > { %v1418_v62 = vpop.permute.xlu0 %1417 }
 0x439   : > { %v1421_v59 = vpop.permute.xlu1 %1420  ;;  %v1443_v0 = vrot.slane %v1418_v62, %v2456_v27 }
 0x43a   : > { %v1989_v14 = vpop.eup %1988  ;;  %v1447_v2 = vrot.slane %v1421_v59, %v2456_v27 }
 0x43b   : > { %v1991_v22 = vpop.eup %1990  ;;  %v1386_v45 = vmul.f32 %v1989_v14, %v1320_v17 }
 0x43c   : > { %v1993_v32 = vpop.eup %1992  ;;  %v1393_v8 = vmul.f32 0.6931472, %v1991_v22  ;;  %v1472_v52 = vsel %vm1055_vm5, %v1447_v2, %v1443_v0 }
 0x43d   : > { %v1995_v24 = vpop.eup %1994  ;;  %v1390_v43 = vadd.f32 %v1993_v32, %v1386_v45  ;;  %v1424_v63 = vpop.permute.xlu1 %1423  ;;  %v419_v45 = vld [vmem:[%s393_s27] sm:$0xff]  ;;  %s1573_s27 = scalar_lea.sflag [#allocation6], %s372_s17 }
 0x43e   : > { %v1395_v38 = vmul.f32 0.6931472, %v1995_v24  ;;  %v1997_v30 = vpop.eup %1996  ;;  %v1400_v44 = vadd.f32 %v1393_v8, %v1356_v18  ;;  %v1451_v9 = vrot.slane %v1424_v63, %v2456_v27 }
 0x43f   : > { %1998 = vlog2.f32 %v1390_v43  ;;  %v1399_v7 = vmul.f32 0.6931472, %v1997_v30 }
 0x440   : > { %v1401_v41 = vadd.f32 %v1395_v38, %v2557_v51  ;;  %v1404_v37 = vsub.f32 %v1400_v44, %v2553_v40  ;;  %v1514_v51 = vsel %vm1496_vm12, %v420_v48, 0.0  ;;  %v423_v40 = vld [vmem:[%s400_s26 + $0x18] sm:$0xff]  ;;  %v1473_v20 = vsel %vm1057_vm6, %v1451_v9, %v1472_v52 }
 0x441   : > { %v1403_v47 = vadd.f32 %v1399_v7, %v2568_v42  ;;  %v1516_v49 = vadd.f32 %v1515_v6, %v1514_v51  ;;  %v1519_v23 = vsel %vm1496_vm12, %v423_v40, 0.0  ;;  %v1430_v5 = vpop.permute.xlu1 %1429 }
 0x442   : > { %v1405_v33 = vsub.f32 %v1401_v41, %v2550_v35  ;;  %v1492_v39 = vmul.f32 %v1404_v37, %v420_v48  ;;  %v1459_v15 = vrot.slane %v1430_v5, %v2456_v27 }
 0x443   : > { %v1407_v57 = vsub.f32 %v1403_v47, %v2560_v50  ;;  %v1518_v50 = vadd.f32 %v1517_v46, %v1516_v49 }
 0x444   : > { %v1493_v1 = vmul.f32 %v1405_v33, %v421_v36  ;;  %v1497_v35 = vsel %vm1496_vm12, %v1492_v39, 0.0 }
 0x445   : > { %v1495_v53 = vmul.f32 %v1407_v57, %v423_v40  ;;  %v1436_v13 = vpop.permute.xlu1 %1435 }
 0x446   : > { %v1498_v4 = vsel %vm1496_vm12, %v1493_v1, 0.0  ;;  %v1467_v34 = vrot.slane %v1436_v13, %v2456_v27 }
 0x447   : > { %v1499_v55 = vadd.f32 %v1498_v4, %v1497_v35  ;;  %v1502_v54 = vsel %vm1496_vm12, %v1495_v53, 0.0  ;;  %v1530_v35 = vld [vmem:[#allocation2] sm:$0x1] }
 0x449   : > { %v1999_v28 = vpop.eup %1998 }
 0x44a   : > { %v1397_v3 = vmul.f32 0.6931472, %v1999_v28 }
 0x44c   : > { %v1402_v18 = vadd.f32 %v1397_v3, %v1358_v25  ;;  %v1427_v25 = vpop.permute.xlu0 %1426 }
 0x44d   : > { %v1455_v21 = vrot.slane %v1427_v25, %v2456_v27 }
 0x44e   : > { %v1406_v19 = vsub.f32 %v1402_v18, %v1354_v61  ;;  %v1520_v61 = vadd.f32 %v1519_v23, %v1518_v50 }
 0x44f   : > { %v1474_v10 = vsel %vm1059_vm7, %v1455_v21, %v1473_v20 }
 0x450   : > { %v1494_v42 = vmul.f32 %v1406_v19, %v422_v16  ;;  %v1433_v11 = vpop.permute.xlu0 %1432  ;;  %v1475_v56 = vsel %vm1061_vm8, %v1459_v15, %v1474_v10  ;;  %v1535_v19 = vld [vmem:[#allocation3] sm:$0x1] }
 0x451   : > { %v1463_v12 = vrot.slane %v1433_v11, %v2456_v27 }
 0x452   : > { %v1500_v29 = vsel %vm1496_vm12, %v1494_v42, 0.0 }
 0x453   : > { %v1501_v58 = vadd.f32 %v1500_v29, %v1499_v55  ;;  %v1476_v17 = vsel %vm1063_vm9, %v1463_v12, %v1475_v56 }
 0x454   : > { %v1477_v32 = vsel %vm1065_vm10, %v1467_v34, %v1476_v17 }
 0x455   : > { %v1503_v60 = vadd.f32 %v1502_v54, %v1501_v58 }
 0x457   : > { %1504 = vadd.xlane.f32.xlu0 %v1503_v60 }
 0x45b   : > { %1521 = vadd.xlane.f32.xlu0 %v1520_v61 }
 0x47e   : > { %v1439_v14 = vpop.permute.xlu0 %1438 }
 0x47f   : > { %v1471_v22 = vrot.slane %v1439_v14, %v2456_v27 }
 0x481   : > { %v1478_v24 = vsel %vm1067_vm11, %v1471_v22, %v1477_v32 }
 0x482   : > { %v1480_v43 = vmul.f32 %v1478_v24, %v419_v45 }
 0x484   : > { %v1482_v8 = vsel %vm1481_vm13, %v1480_v43, 0.0 }
 0x485   : > { %1483 = vadd.xlane.f32.xlu1 %v1482_v8 }
 0x4e4   : > { %v1505_v38 = vpop.xlane.xlu0 %1504 }
 0x4e5   : > { %v1506_v44 = vrot.slane %v1505_v38, 4 }
 0x4e7   : > { %v1507_v7 = vadd.f32 %v1506_v44, %v1505_v38 }
 0x4e8   : > { %v1522_v30 = vpop.xlane.xlu0 %1521 }
 0x4e9   : > { %v1523_v41 = vrot.slane %v1522_v30, 4  ;;  %v1508_v48 = vrot.slane %v1507_v7, 2 }
 0x4eb   : > { %v1524_v37 = vadd.f32 %v1523_v41, %v1522_v30  ;;  %v1509_v36 = vadd.f32 %v1508_v48, %v1507_v7 }
 0x4ed   : > { %v1525_v47 = vrot.slane %v1524_v37, 2  ;;  %v1510_v18 = vrot.slane %v1509_v36, 1 }
 0x4ef   : > { %v1526_v39 = vadd.f32 %v1525_v47, %v1524_v37  ;;  %v1511_v16 = vadd.f32 %v1510_v18, %v1509_v36 }
 0x4f1   : > { %v1527_v1 = vrot.slane %v1526_v39, 1 }
 0x4f3   : > { %v1528_v40 = vadd.f32 %v1527_v1, %v1526_v39 }
 0x512   : > { %v1484_v33 = vpop.xlane.xlu1 %1483 }
 0x513   : > { %v1485_v28 = vrot.slane %v1484_v33, 4 }
 0x515   : > { %v1486_v27 = vadd.f32 %v1485_v28, %v1484_v33 }
 0x517   : > { %v1487_v3 = vrot.slane %v1486_v27, 2 }
 0x519   : > { %v1488_v51 = vadd.f32 %v1487_v3, %v1486_v27 }
 0x51b   : > { %v1489_v57 = vrot.slane %v1488_v51, 1 }
 0x51d   : > { %v1490_v6 = vadd.f32 %v1489_v57, %v1488_v51 }
 0x51f   : > { %1823 = vpush %v1490_v6 }
 0x520   : > { %1825 = vpush %v1511_v16 }
 0x521   : > { %1827 = vpush %v1528_v40 }
 0x550   : > { %s1824_s15 = spop %1823 }
 0x551   : > { %s1826_s25 = spop %1825 }
 0x552   : > { %s1513_s7 = sadd.f32 %s1826_s25, %s1824_s15  ;;  %s1828_s13 = spop %1827 }
 0x553   : > { %v1536_v49 = vstv %s1828_s13  ;;  %s2085_s15 = smov [#allocation5]  }
 0x554   : > { %v1531_v42 = vstv %s1513_s7  ;;  %v1537_v53 = vadd.f32 %v1536_v49, %v1535_v19  ;;  %s2004_s25 = sshll.u32 %s2085_s15, 4  ;;  %s2005_s25 = int_to_ptr.vmem [resolvable:$false] %s2004_s25 }
 0x555   : > { %v1532_v4 = vadd.f32 %v1531_v42, %v1530_v35  ;;  %s2006_s7 = scalar_lea.vmem %s2005_s25, 256  ;;  %p2007_p2 = scmp.lt.s32.totalorder %s2631_s24, %s2005_s25 }
 0x556   : > { %1538 = vst.msk [vmem:[#allocation3] sm:$0x1] %vm407_vm0, %v1537_v53  ;;  %p2008_p3 = scmp.lt.s32.totalorder %s2006_s7, %s2000_s10 }
 0x557   : > { %1534 = vst.msk [vmem:[#allocation2] sm:$0x1] %vm407_vm0, %v1532_v4 }
 0x558   : > { %p2009_p5 = por %p2008_p3, %p2007_p2 }
 0x55a   : > { %p2010_p6 = pnand %p2009_p5, %p2003_p1 }
 0x55d   : > { %v1711_v46 = vld [vmem:[#allocation3] ss:$0 sm:$0xff] }
 0x55e   : > { %1557 = vperm.xlu1 %1889, %v1711_v46   ;;  %v1712_v55 = vld [vmem:[#allocation2] ss:$0 sm:$0xff] }
 0x55f   : > { %1567 = vperm.xlu0 %1890, %v1712_v55  }
 0x5dd   : > { %v1558_v29 = vpop.permute.xlu1 %1557 }
 0x5de   : > { %v1560_v58 = vsel %vm1549_vm2, %v1558_v29, 0.0  ;;  %v1568_v50 = vpop.permute.xlu0 %1567 }
 0x5df   : > { %v1570_v31 = vsel %vm1546_vm3, %v1568_v50, %v1560_v58 }
 0x5e0   : > { %1571 = vst [vmem:[%s374_s23] sm:$0xff] %v1570_v31 }
 0x5e1   : > { %2013 = shalt.err (!%p2010_p6)
}
 0x5e2   : > { %s2014_s13 = scalar_lea.hbm %s2629_s22, 128  ;;  %s2018_s21 = scalar_lea.hbm %s2684_s8, 256 }
 0x5e3   : > { %p2015_p7 = scmp.ne.s32.totalorder %s2629_s22, %s2014_s13  ;;  %p2019_p11 = scmp.lt.u32.totalorder %s2629_s22, %s2684_s8 }
 0x5e4   : > { %p2020_p12 = scmp.lt.u32.totalorder %s2018_s21, %s2014_s13  ;;  %p2022_p0 = scmp.lt.u32.totalorder %s2014_s13, %s2629_s22 }
 0x5e5   : > { %p2016_p9 = pnand %p2015_p7, %p2174_p4 }
 0x5e6   : > { %p2021_p13 = por %p2020_p12, %p2019_p11 }
 0x5e7   : > { %p2017_p10 = pneg %p2016_p9 }
 0x5e8   : > { %p2023_p1 = por %p2022_p0, %p2021_p13 }
 0x5ea   : > { %p2024_p2 = pnand %p2023_p1, %p2017_p10 }
 0x5ec   : > { %2027 = shalt.err (!%p2024_p2)
}
 0x5ed   : > { %1829 = dma.vmem_to_hbm [thread:$0]  (%p2174_p4), %s2631_s24, 128, %s2629_s22, %s1573_s27  }
 0x5ee PF: > { %p1835_p3 = scmp.ge.s32.totalorder %s2078_s12, 2  ;;  %s1598_s28 = sand.u32 1, %s2058_s29  }
 0x5ef   : > { %s1599_s10 = scalar_lea.sflag [#allocation6], %s1598_s28 }
 0x5f0   : > { %p1832_p5 = pnand %p1835_p3, %p2181_p8 }
 0x5f2   : > { %2053 = dma.done.wait (!%p1832_p5), %s1599_s10, 128  }
 0x5f3   : > { %2055 = vsyncadd (!%p1832_p5), %s1599_s10, 4294967168  ;;  %s22_s12 = sadd.s32 1, %s2078_s12   ;;  %s2687_s29 = smov %s2062_s30 }
 0x5f4   : > { %p19_p6 = scmp.ge.s32.totalorder %s22_s12, 4   ;;  %s2688_s30 = smov %s2066_s9 }
 0x5f5   : > { %s2689_s9 = smov %s2187_s19  ;;  %s2690_s10 = smov %s2074_s11 }
 0x5f6   : > { %s2691_s11 = smov %s2693_s14  ;;  %21 = sbr.rel (!%p19_p6) target bundleno = 6 (0x6), region = 104 }
 0x5fd   :  { %1604 = vsyncpa [#allocation6], 1 }
 0x5fe   :  { %1606 = vsyncpa [#allocation6 + $0x1], 1 }

</bundles_post_ra>
